<compile_context>
chip_gen: v7x
topology: tpu7x:2x2x1
jax: 0.10.0
libtpu: 0.0.40
codegen_flags: <defaults>
</compile_context>

<pallas_src>
import math
import functools

import jax
import jax.numpy as jnp
import numpy as np
from jax.experimental import pallas as pl
from jax.experimental.pallas import tpu as pltpu

# --- model config (small, deterministic) ---
BATCH = 2
SEQ = 8
HIDDEN = 32
VOCAB = 128
LN_EPS = 1e-12

_INV_SQRT2 = 1.0 / math.sqrt(2.0)


def _erf(z):
    # Abramowitz & Stegun 7.1.26 polynomial approximation of erf, |error| < 1.5e-7.
    # Uses only abs / mul / add / div / exp / where, which all lower cleanly on TPU.
    az = jnp.abs(z)
    t = 1.0 / (1.0 + 0.3275911 * az)
    poly = t * (0.254829592
                + t * (-0.284496736
                       + t * (1.421413741
                              + t * (-1.453152027 + t * 1.061405429))))
    e = 1.0 - poly * jnp.exp(-az * az)
    return jnp.where(z < 0.0, -e, e)


def lm_head_kernel(x_ref, wt_ref, bt_ref, gamma_ref, beta_ref, wd_ref, bd_ref,
                   out_ref, *, eps):
    x = x_ref[...]                                              # [B*S, H]

    # transform.dense: y = x @ Wt^T + bt (weight passed pre-transposed)
    h = jnp.dot(x, wt_ref[...], preferred_element_type=jnp.float32) + bt_ref[...]

    # transform_act_fn == ACT2FN['gelu']  (exact erf gelu, matching torch)
    h = 0.5 * h * (1.0 + _erf(h * _INV_SQRT2))

    # transform.LayerNorm (biased variance, eps inside the sqrt)
    mu = jnp.mean(h, axis=-1, keepdims=True)
    var = jnp.mean((h - mu) * (h - mu), axis=-1, keepdims=True)
    normed = (h - mu) * jax.lax.rsqrt(var + eps)
    normed = normed * gamma_ref[...] + beta_ref[...]

    # decoder: logits = normed @ Wd^T + bias (weight passed pre-transposed)
    logits = jnp.dot(normed, wd_ref[...], preferred_element_type=jnp.float32) + bd_ref[...]
    out_ref[...] = logits.astype(out_ref.dtype)


def bert_lm_prediction_head(hidden_states, params):
    """hidden_states: [B, S, H] -> logits [B, S, V]."""
    B, S, H = hidden_states.shape
    wt, bt, gamma, beta, wd, bd = params
    V = wd.shape[1]
    BS = B * S
    x2d = hidden_states.reshape(BS, H)   # collapse batch/seq into one row slab

    kernel = functools.partial(lm_head_kernel, eps=LN_EPS)

    out2d = pl.pallas_call(
        kernel,
        out_shape=jax.ShapeDtypeStruct((BS, V), hidden_states.dtype),
        grid_spec=pltpu.PrefetchScalarGridSpec(
            num_scalar_prefetch=0,
            grid=(1,),                                     # whole problem in one step
            in_specs=[
                pl.BlockSpec((BS, H), lambda i: (0, 0)),   # hidden_states (flattened)
                pl.BlockSpec((H, H), lambda i: (0, 0)),    # transform dense W (pre-T)
                pl.BlockSpec((1, H), lambda i: (0, 0)),    # transform dense bias
                pl.BlockSpec((1, H), lambda i: (0, 0)),    # LayerNorm gamma
                pl.BlockSpec((1, H), lambda i: (0, 0)),    # LayerNorm beta
                pl.BlockSpec((H, V), lambda i: (0, 0)),    # decoder W (pre-T)
                pl.BlockSpec((1, V), lambda i: (0, 0)),    # decoder bias
            ],
            out_specs=pl.BlockSpec((BS, V), lambda i: (0, 0)),
        ),
        compiler_params=pltpu.CompilerParams(
            dimension_semantics=("arbitrary",)),
    )(x2d, wt, bt, gamma, beta, wd, bd)

    return out2d.reshape(B, S, V)


def reference_lm_head(x, params):
    """Pure-JAX reference mirroring the PyTorch BertLMPredictionHead (eval mode)."""
    wt, bt, gamma, beta, wd, bd = params
    h = x @ wt + bt[0]
    h = jax.nn.gelu(h, approximate=False)          # exact erf gelu == ACT2FN['gelu']
    mu = jnp.mean(h, axis=-1, keepdims=True)
    var = jnp.mean((h - mu) ** 2, axis=-1, keepdims=True)
    h = (h - mu) / jnp.sqrt(var + LN_EPS) * gamma[0] + beta[0]
    return h @ wd + bd[0]


if __name__ == "__main__":
    key = jax.random.PRNGKey(0)
    keys = jax.random.split(key, 7)

    scale = 0.2   # large enough that the gelu nonlinearity is actually exercised
    # nn.Linear weights are [out, in]; pass transposed so the kernel does x @ W + b.
    wt = scale * jax.random.normal(keys[0], (HIDDEN, HIDDEN), jnp.float32)
    bt = scale * jax.random.normal(keys[1], (1, HIDDEN), jnp.float32)
    gamma = 1.0 + 0.1 * jax.random.normal(keys[2], (1, HIDDEN), jnp.float32)
    beta = 0.1 * jax.random.normal(keys[3], (1, HIDDEN), jnp.float32)
    wd = scale * jax.random.normal(keys[4], (HIDDEN, VOCAB), jnp.float32)
    bd = scale * jax.random.normal(keys[5], (1, VOCAB), jnp.float32)
    params = (wt, bt, gamma, beta, wd, bd)

    hidden_states = jax.random.normal(keys[6], (BATCH, SEQ, HIDDEN), jnp.float32)

    out = bert_lm_prediction_head(hidden_states, params)
    out = jax.block_until_ready(out)

    ref = reference_lm_head(hidden_states, params)
    np.testing.assert_allclose(np.asarray(out), np.asarray(ref), rtol=1e-5, atol=1e-5)

    print("KERNEL_OK")
</pallas_src>

<mosaic_0001>
module attributes {stable_mosaic.version = 11 : i64} {
  func.func @lm_head_kernel(%arg0: i32, %arg1: memref<16x32xf32, #tpu.memory_space<vmem>>, %arg2: memref<32x32xf32, #tpu.memory_space<vmem>>, %arg3: memref<1x32xf32, #tpu.memory_space<vmem>>, %arg4: memref<1x32xf32, #tpu.memory_space<vmem>>, %arg5: memref<1x32xf32, #tpu.memory_space<vmem>>, %arg6: memref<32x128xf32, #tpu.memory_space<vmem>>, %arg7: memref<1x128xf32, #tpu.memory_space<vmem>>, %arg8: memref<16x128xf32, #tpu.memory_space<vmem>>) attributes {dimension_semantics = [#tpu.dimension_semantics<arbitrary>], iteration_bounds = array<i64: 1>, scalar_prefetch = 0 : i64, scratch_operands = 0 : i64, tpu.core_type = #tpu.core_type<tc>, window_params = [{pipeline_mode = #tpu.pipeline_mode<synchronous>, transform_indices = @transform_0, window_bounds = array<i64: 16, 32>}, {pipeline_mode = #tpu.pipeline_mode<synchronous>, transform_indices = @transform_1, window_bounds = array<i64: 32, 32>}, {pipeline_mode = #tpu.pipeline_mode<synchronous>, transform_indices = @transform_2, window_bounds = array<i64: 1, 32>}, {pipeline_mode = #tpu.pipeline_mode<synchronous>, transform_indices = @transform_3, window_bounds = array<i64: 1, 32>}, {pipeline_mode = #tpu.pipeline_mode<synchronous>, transform_indices = @transform_4, window_bounds = array<i64: 1, 32>}, {pipeline_mode = #tpu.pipeline_mode<synchronous>, transform_indices = @transform_5, window_bounds = array<i64: 32, 128>}, {pipeline_mode = #tpu.pipeline_mode<synchronous>, transform_indices = @transform_6, window_bounds = array<i64: 1, 128>}, {pipeline_mode = #tpu.pipeline_mode<synchronous>, transform_indices = @transform_7, window_bounds = array<i64: 16, 128>}]} {
    %c0 = arith.constant 0 : index
    %c0_0 = arith.constant 0 : index
    %0 = vector.load %arg1[%c0, %c0_0] : memref<16x32xf32, #tpu.memory_space<vmem>>, vector<16x32xf32>
    %c0_1 = arith.constant 0 : index
    %c0_2 = arith.constant 0 : index
    %1 = vector.load %arg2[%c0_1, %c0_2] : memref<32x32xf32, #tpu.memory_space<vmem>>, vector<32x32xf32>
    %cst = arith.constant dense<0.000000e+00> : vector<16x32xf32>
    %2 = tpu.matmul %0, %1, %cst {dimension_numbers = #tpu.dot_dimension_numbers<[1], [0], [0], [1], [0, 0, 1, 1], [], []>} : vector<16x32xf32>, vector<32x32xf32>, vector<16x32xf32> -> vector<16x32xf32>
    %c0_3 = arith.constant 0 : index
    %c0_4 = arith.constant 0 : index
    %3 = vector.load %arg3[%c0_3, %c0_4] : memref<1x32xf32, #tpu.memory_space<vmem>>, vector<1x32xf32>
    %4 = vector.broadcast %3 : vector<1x32xf32> to vector<16x32xf32>
    %5 = arith.addf %2, %4 : vector<16x32xf32>
    %cst_5 = arith.constant 5.000000e-01 : f32
    %6 = vector.broadcast %cst_5 : f32 to vector<16x32xf32>
    %7 = arith.mulf %6, %5 : vector<16x32xf32>
    %cst_6 = arith.constant 0.707106769 : f32
    %8 = vector.broadcast %cst_6 : f32 to vector<16x32xf32>
    %9 = arith.mulf %5, %8 : vector<16x32xf32>
    %10 = math.absf %9 : vector<16x32xf32>
    %cst_7 = arith.constant 0.327591091 : f32
    %11 = vector.broadcast %cst_7 : f32 to vector<16x32xf32>
    %12 = arith.mulf %11, %10 : vector<16x32xf32>
    %cst_8 = arith.constant 1.000000e+00 : f32
    %13 = vector.broadcast %cst_8 : f32 to vector<16x32xf32>
    %14 = arith.addf %13, %12 : vector<16x32xf32>
    %cst_9 = arith.constant 1.000000e+00 : f32
    %15 = vector.broadcast %cst_9 : f32 to vector<16x32xf32>
    %16 = arith.divf %15, %14 : vector<16x32xf32>
    %cst_10 = arith.constant 1.06140542 : f32
    %17 = vector.broadcast %cst_10 : f32 to vector<16x32xf32>
    %18 = arith.mulf %16, %17 : vector<16x32xf32>
    %cst_11 = arith.constant -1.45315206 : f32
    %19 = vector.broadcast %cst_11 : f32 to vector<16x32xf32>
    %20 = arith.addf %19, %18 : vector<16x32xf32>
    %21 = arith.mulf %16, %20 : vector<16x32xf32>
    %cst_12 = arith.constant 1.42141378 : f32
    %22 = vector.broadcast %cst_12 : f32 to vector<16x32xf32>
    %23 = arith.addf %22, %21 : vector<16x32xf32>
    %24 = arith.mulf %16, %23 : vector<16x32xf32>
    %cst_13 = arith.constant -0.284496725 : f32
    %25 = vector.broadcast %cst_13 : f32 to vector<16x32xf32>
    %26 = arith.addf %25, %24 : vector<16x32xf32>
    %27 = arith.mulf %16, %26 : vector<16x32xf32>
    %cst_14 = arith.constant 0.254829586 : f32
    %28 = vector.broadcast %cst_14 : f32 to vector<16x32xf32>
    %29 = arith.addf %28, %27 : vector<16x32xf32>
    %30 = arith.mulf %16, %29 : vector<16x32xf32>
    %cst_15 = arith.constant 0.000000e+00 : f32
    %31 = vector.broadcast %cst_15 : f32 to vector<16x32xf32>
    %32 = arith.subf %31, %10 : vector<16x32xf32>
    %33 = arith.mulf %32, %10 : vector<16x32xf32>
    %34 = math.exp %33 : vector<16x32xf32>
    %35 = arith.mulf %30, %34 : vector<16x32xf32>
    %cst_16 = arith.constant 1.000000e+00 : f32
    %36 = vector.broadcast %cst_16 : f32 to vector<16x32xf32>
    %37 = arith.subf %36, %35 : vector<16x32xf32>
    %cst_17 = arith.constant 0.000000e+00 : f32
    %38 = vector.broadcast %cst_17 : f32 to vector<16x32xf32>
    %39 = arith.cmpf olt, %9, %38 : vector<16x32xf32>
    %cst_18 = arith.constant 0.000000e+00 : f32
    %40 = vector.broadcast %cst_18 : f32 to vector<16x32xf32>
    %41 = arith.subf %40, %37 : vector<16x32xf32>
    %42 = arith.select %39, %41, %37 : vector<16x32xi1>, vector<16x32xf32>
    %cst_19 = arith.constant 1.000000e+00 : f32
    %43 = vector.broadcast %cst_19 : f32 to vector<16x32xf32>
    %44 = arith.addf %43, %42 : vector<16x32xf32>
    %45 = arith.mulf %7, %44 : vector<16x32xf32>
    %cst_20 = arith.constant dense<0.000000e+00> : vector<16xf32>
    %46 = vector.multi_reduction <add>, %45, %cst_20 [1] : vector<16x32xf32> to vector<16xf32>
    %47 = vector.shape_cast %46 : vector<16xf32> to vector<16x1xf32>
    %cst_21 = arith.constant 3.200000e+01 : f32
    %48 = vector.broadcast %cst_21 : f32 to vector<16x1xf32>
    %49 = arith.divf %47, %48 : vector<16x1xf32>
    %50 = vector.broadcast %49 : vector<16x1xf32> to vector<16x32xf32>
    %51 = arith.subf %45, %50 : vector<16x32xf32>
    %52 = vector.broadcast %49 : vector<16x1xf32> to vector<16x32xf32>
    %53 = arith.subf %45, %52 : vector<16x32xf32>
    %54 = arith.mulf %51, %53 : vector<16x32xf32>
    %cst_22 = arith.constant dense<0.000000e+00> : vector<16xf32>
    %55 = vector.multi_reduction <add>, %54, %cst_22 [1] : vector<16x32xf32> to vector<16xf32>
    %56 = vector.shape_cast %55 : vector<16xf32> to vector<16x1xf32>
    %cst_23 = arith.constant 3.200000e+01 : f32
    %57 = vector.broadcast %cst_23 : f32 to vector<16x1xf32>
    %58 = arith.divf %56, %57 : vector<16x1xf32>
    %59 = vector.broadcast %49 : vector<16x1xf32> to vector<16x32xf32>
    %60 = arith.subf %45, %59 : vector<16x32xf32>
    %cst_24 = arith.constant 9.99999996E-13 : f32
    %61 = vector.broadcast %cst_24 : f32 to vector<16x1xf32>
    %62 = arith.addf %58, %61 : vector<16x1xf32>
    %63 = math.rsqrt %62 : vector<16x1xf32>
    %64 = vector.broadcast %63 : vector<16x1xf32> to vector<16x32xf32>
    %65 = arith.mulf %60, %64 : vector<16x32xf32>
    %c0_25 = arith.constant 0 : index
    %c0_26 = arith.constant 0 : index
    %66 = vector.load %arg4[%c0_25, %c0_26] : memref<1x32xf32, #tpu.memory_space<vmem>>, vector<1x32xf32>
    %67 = vector.broadcast %66 : vector<1x32xf32> to vector<16x32xf32>
    %68 = arith.mulf %65, %67 : vector<16x32xf32>
    %c0_27 = arith.constant 0 : index
    %c0_28 = arith.constant 0 : index
    %69 = vector.load %arg5[%c0_27, %c0_28] : memref<1x32xf32, #tpu.memory_space<vmem>>, vector<1x32xf32>
    %70 = vector.broadcast %69 : vector<1x32xf32> to vector<16x32xf32>
    %71 = arith.addf %68, %70 : vector<16x32xf32>
    %c0_29 = arith.constant 0 : index
    %c0_30 = arith.constant 0 : index
    %72 = vector.load %arg6[%c0_29, %c0_30] : memref<32x128xf32, #tpu.memory_space<vmem>>, vector<32x128xf32>
    %cst_31 = arith.constant dense<0.000000e+00> : vector<16x128xf32>
    %73 = tpu.matmul %71, %72, %cst_31 {dimension_numbers = #tpu.dot_dimension_numbers<[1], [0], [0], [1], [0, 0, 1, 1], [], []>} : vector<16x32xf32>, vector<32x128xf32>, vector<16x128xf32> -> vector<16x128xf32>
    %c0_32 = arith.constant 0 : index
    %c0_33 = arith.constant 0 : index
    %74 = vector.load %arg7[%c0_32, %c0_33] : memref<1x128xf32, #tpu.memory_space<vmem>>, vector<1x128xf32>
    %75 = vector.broadcast %74 : vector<1x128xf32> to vector<16x128xf32>
    %76 = arith.addf %73, %75 : vector<16x128xf32>
    %c0_34 = arith.constant 0 : index
    %c0_35 = arith.constant 0 : index
    %77 = vector.load %arg8[%c0_34, %c0_35] : memref<16x128xf32, #tpu.memory_space<vmem>>, vector<16x128xf32>
    tpu.vector_store %arg8[%c0_34, %c0_35], %76 {strides = array<i32>} : memref<16x128xf32, #tpu.memory_space<vmem>>, vector<16x128xf32>,
    return
  }
  func.func @transform_0(%arg0: i32) -> (i32, i32) {
    %c0_i32 = arith.constant 0 : i32
    %c0_i32_0 = arith.constant 0 : i32
    %c0_i32_1 = arith.constant 0 : i32
    return %c0_i32, %c0_i32_0 : i32, i32
  }
  func.func @transform_1(%arg0: i32) -> (i32, i32) {
    %c0_i32 = arith.constant 0 : i32
    %c0_i32_0 = arith.constant 0 : i32
    %c0_i32_1 = arith.constant 0 : i32
    return %c0_i32, %c0_i32_0 : i32, i32
  }
  func.func @transform_2(%arg0: i32) -> (i32, i32) {
    %c0_i32 = arith.constant 0 : i32
    %c0_i32_0 = arith.constant 0 : i32
    %c0_i32_1 = arith.constant 0 : i32
    return %c0_i32, %c0_i32_0 : i32, i32
  }
  func.func @transform_3(%arg0: i32) -> (i32, i32) {
    %c0_i32 = arith.constant 0 : i32
    %c0_i32_0 = arith.constant 0 : i32
    %c0_i32_1 = arith.constant 0 : i32
    return %c0_i32, %c0_i32_0 : i32, i32
  }
  func.func @transform_4(%arg0: i32) -> (i32, i32) {
    %c0_i32 = arith.constant 0 : i32
    %c0_i32_0 = arith.constant 0 : i32
    %c0_i32_1 = arith.constant 0 : i32
    return %c0_i32, %c0_i32_0 : i32, i32
  }
  func.func @transform_5(%arg0: i32) -> (i32, i32) {
    %c0_i32 = arith.constant 0 : i32
    %c0_i32_0 = arith.constant 0 : i32
    %c0_i32_1 = arith.constant 0 : i32
    return %c0_i32, %c0_i32_0 : i32, i32
  }
  func.func @transform_6(%arg0: i32) -> (i32, i32) {
    %c0_i32 = arith.constant 0 : i32
    %c0_i32_0 = arith.constant 0 : i32
    %c0_i32_1 = arith.constant 0 : i32
    return %c0_i32, %c0_i32_0 : i32, i32
  }
  func.func @transform_7(%arg0: i32) -> (i32, i32) {
    %c0_i32 = arith.constant 0 : i32
    %c0_i32_0 = arith.constant 0 : i32
    %c0_i32_1 = arith.constant 0 : i32
    return %c0_i32, %c0_i32_0 : i32, i32
  }
}

</mosaic_0001>

<bundles_post_ra>
// kernel: tpu_custom_call.1
= control target key start
LH: loop header
LB: loop body
LE: loop exit
PB: predicated region body
PF: predicated region fallthrough
CT: control target
= control target key end

     0   :  { %12 = vsyncpa [#allocation3], 0  ;;  %s677_s0 = inlined_call_operand.hbm [shape: f32[16,32], index: 0, kind: input, shape index: {}]   ;;  %s678_s1 = inlined_call_operand.hbm [shape: f32[32,32], index: 1, kind: input, shape index: {}]   ;;  %s679_s2 = inlined_call_operand.vmem [shape: f32[1,32], index: 2, kind: input, shape index: {}]   ;;  %s680_s3 = inlined_call_operand.vmem [shape: f32[1,32], index: 3, kind: input, shape index: {}]   ;;  %s681_s4 = inlined_call_operand.vmem [shape: f32[1,32], index: 4, kind: input, shape index: {}]   ;;  %s682_s5 = inlined_call_operand.hbm [shape: f32[32,128], index: 5, kind: input, shape index: {}]   ;;  %s683_s6 = inlined_call_operand.vmem [shape: f32[1,128], index: 6, kind: input, shape index: {}]   ;;  %s684_s7 = inlined_call_operand.hbm [shape: f32[16,128], index: 7, kind: output, shape index: {}]  }
   0x1   :  { %13 = vsyncpa [#allocation6], 0 }
   0x2   :  { %14 = vsyncpa [#allocation4], 0  ;;  %s544_s24 = smov [#allocation5]   ;;  %s545_s26 = smov [#allocation2]  }
   0x3   :  { %s32_s25 = sshll.u32 %s544_s24, 4  ;;  %s20_s27 = sshll.u32 %s545_s26, 4  ;;  %s33_s25 = int_to_ptr.vmem [resolvable:$true] %s32_s25  ;;  %s590_s27 = int_to_ptr.vmem [resolvable:$true] %s20_s27 }
   0x4   :  { %s450_s30 = scalar_lea.hbm %s678_s1, 512 }
   0x5   :  { %p451_p0 = scmp.ne.s32.totalorder %s678_s1, %s450_s30  ;;  %p454_p1 = scmp.lt.u32.totalorder %s450_s30, %s678_s1 }
   0x7   :  { %p456_p2 = pnand %p454_p1, %p451_p0 }
   0x9   :  { %459 = shalt.err (!%p456_p2)
}
   0xa   :  { %s460_s12 = scalar_lea.vmem %s33_s25, 512  ;;  %p465_p4 = scmp.lt.s32.totalorder %s33_s25, %s33_s25 }
   0xb   :  { %p461_p3 = scmp.ne.s32.totalorder %s33_s25, %s460_s12  ;;  %p466_p5 = scmp.lt.s32.totalorder %s460_s12, %s460_s12 }
   0xd   :  { %p467_p6 = por %p466_p5, %p465_p4 }
   0xf   :  { %p468_p7 = pnand %p467_p6, %p461_p3 }
  0x11   :  { %471 = shalt.err (!%p468_p7)
}
  0x12   :  { %s546_s13 = smov 128   ;;  %s547_s14 = smov 8  }
  0x13   :  { %38 = dma.hbm_to_vmem [thread:$0]  %s678_s1, 512, %s33_s25, [#allocation6], %s546_s13, %s546_s13, %s547_s14  }
  0x14   :  { %s472_s19 = scalar_lea.hbm %s677_s0, 256 }
  0x15   :  { %p473_p8 = scmp.ne.s32.totalorder %s677_s0, %s472_s19  ;;  %p476_p9 = scmp.lt.u32.totalorder %s472_s19, %s677_s0 }
  0x17   :  { %p478_p10 = pnand %p476_p9, %p473_p8 }
  0x19   :  { %481 = shalt.err (!%p478_p10)
}
  0x1a   :  { %s482_s24 = scalar_lea.vmem %s590_s27, 256  ;;  %p487_p12 = scmp.lt.s32.totalorder %s590_s27, %s590_s27 }
  0x1b   :  { %p483_p11 = scmp.ne.s32.totalorder %s590_s27, %s482_s24  ;;  %p488_p13 = scmp.lt.s32.totalorder %s482_s24, %s482_s24 }
  0x1d   :  { %p489_p0 = por %p488_p13, %p487_p12 }
  0x1f   :  { %p490_p1 = pnand %p489_p0, %p483_p11 }
  0x21   :  { %493 = shalt.err (!%p490_p1)
}
  0x22   :  { %26 = dma.hbm_to_vmem [thread:$0]  %s677_s0, 256, %s590_s27, [#allocation3], %s546_s13, %s546_s13, %s547_s14  }
  0x23   :  { %s548_s26 = smov [#allocation7]   ;;  %s494_s8 = scalar_lea.hbm %s682_s5, 512 }
  0x24   :  { %s50_s28 = sshll.u32 %s548_s26, 4  ;;  %p495_p2 = scmp.ne.s32.totalorder %s682_s5, %s494_s8  ;;  %s51_s28 = int_to_ptr.vmem [resolvable:$true] %s50_s28 }
  0x25   :  { %p498_p3 = scmp.lt.u32.totalorder %s494_s8, %s682_s5 }
  0x27   :  { %p500_p4 = pnand %p498_p3, %p495_p2 }
  0x29   :  { %503 = shalt.err (!%p500_p4)
}
  0x2a   :  { %s504_s15 = scalar_lea.vmem %s51_s28, 512  ;;  %p509_p6 = scmp.lt.s32.totalorder %s51_s28, %s51_s28 }
  0x2b   :  { %p505_p5 = scmp.ne.s32.totalorder %s51_s28, %s504_s15  ;;  %p510_p7 = scmp.lt.s32.totalorder %s504_s15, %s504_s15 }
  0x2d   :  { %p511_p8 = por %p510_p7, %p509_p6 }
  0x2f   :  { %p512_p9 = pnand %p511_p8, %p505_p5 }
  0x31   :  { %515 = shalt.err (!%p512_p9)
}
  0x32   :  { %56 = dma.hbm_to_vmem [thread:$0]  %s682_s5, 512, %s51_s28, [#allocation6], %s546_s13, %s546_s13, %s547_s14  }
  0x33   :  { %538 = dma.done.wait [#allocation3], 256  }
  0x34   :  { %539 = vsyncadd [#allocation3], 4294967040 }
  0x35   :  { %540 = dma.done.wait [#allocation6], 1024  }
  0x36   :  { %541 = vsyncadd [#allocation6], 4294966272  ;;  %vm81_vm0 = vcmask 261120   ;;  %v70_v0 = vld [vmem:[#allocation5] sm:$0xff]  ;;  %v71_v1 = vld [vmem:[#allocation5 + $0x8] sm:$0xff] }
  0x37   :  { %v72_v2 = vld [vmem:[#allocation5 + $0x10] sm:$0xff]  ;;  %v416_v3 = vpack.c.bf16 %v71_v1, %v70_v0  ;;  %v73_v4 = vld [vmem:[#allocation5 + $0x18] sm:$0xff] }
  0x38   :  { %v68_v5 = vld [vmem:[#allocation2] sm:$0xff]  ;;  %v420_v6 = vpack.c.bf16 %v73_v4, %v72_v2  ;;  %v69_v7 = vld [vmem:[#allocation2 + $0x8] sm:$0xff] }
  0x39   :  { %402 = vmatprep.mubr.msk.f32.mxu0 %vm81_vm0, %v68_v5  ;;  %417 = vmatprep.subr.bf16.mxu0 %v416_v3  ;;  %v374_v8 = vld [vmem:[%s679_s2] ss:$0 sm:$0xff] }
  0x3a   :  { %419 = vmatpush3.bf16.msra.mxu0 %v416_v3 }
  0x3b   :  { %421 = vmatprep.subr.bf16.mxu0 %v420_v6 }
  0x3e   :  { %423 = vmatpush3.bf16.msra.mxu0 %v420_v6 }
  0x41   :  { %403 = vmatmul.mubr.msk.f32.vlgmr.msra.gmra.mrb[0].mxu0 %vm81_vm0, %v69_v7 }
 0x114   :  { %v404_v9 = vpop.f32.mrb[0].mxu0 }
 0x115   :  { %v160_v10 = vadd.f32 %v404_v9, %v374_v8  ;;  %v154_v11 = vpop.f32.mrb[1].mxu0 }
 0x116   :  { %v155_v12 = vadd.f32 %v374_v8, %v154_v11  ;;  %v262_v11 = vld [vmem:[#allocation7] sm:$0xff] }
 0x117   :  { %v166_v13 = vmul.f32 0.70710677, %v160_v10  ;;  %v164_v60 = vmul.f32 0.5, %v160_v10 }
 0x118   :  { %v165_v14 = vmul.f32 0.70710677, %v155_v12  ;;  %v163_v57 = vmul.f32 0.5, %v155_v12  ;;  %v263_v12 = vld [vmem:[#allocation7 + $0x8] sm:$0xff] }
 0x119   :  { %v168_v15 = vand.u32 2147483647, %v166_v13  ;;  %vm208_vm1 = vcmp.lt.f32.partialorder %v166_v13, 0.0  ;;  %v264_v13 = vld [vmem:[#allocation7 + $0x10] sm:$0xff] }
 0x11a   :  { %v167_v16 = vand.u32 2147483647, %v165_v14  ;;  %vm207_vm2 = vcmp.lt.f32.partialorder %v165_v14, 0.0  ;;  %v424_v14 = vpack.c.bf16 %v263_v12, %v262_v11 }
 0x11b   :  { %v170_v17 = vmul.f32 0.3275911, %v168_v15  ;;  %v196_v21 = vsub.f32 0.0, %v168_v15 }
 0x11c   :  { %v169_v18 = vmul.f32 0.3275911, %v167_v16  ;;  %v195_v22 = vsub.f32 0.0, %v167_v16  ;;  %425 = vmatprep.subr.bf16.mxu1 %v424_v14 }
 0x11d   :  { %v172_v19 = vadd.f32 1.0, %v170_v17  ;;  %v198_v24 = vmul.f32 %v196_v21, %v168_v15  ;;  %v265_v15 = vld [vmem:[#allocation7 + $0x18] sm:$0xff]  ;;  %427 = vmatpush3.bf16.msra.mxu1 %v424_v14 }
 0x11e   :  { %v171_v20 = vadd.f32 1.0, %v169_v18  ;;  %v197_v26 = vmul.f32 %v195_v22, %v167_v16  ;;  %v428_v16 = vpack.c.bf16 %v265_v15, %v264_v13 }
 0x11f   :  { %438 = vrcp.f32 %v172_v19  ;;  %v201_v30 = vmul.f32 1.442695, %v198_v24  ;;  %v377_v24 = vld [vmem:[%s680_s3] ss:$0 sm:$0xff]  ;;  %s549_s3 = smov [#allocation8]  }
 0x120   :  { %440 = vrcp.f32 %v171_v20  ;;  %v199_v32 = vmul.f32 1.442695, %v197_v26  ;;  %429 = vmatprep.subr.bf16.mxu1 %v428_v16  ;;  %v378_v26 = vld [vmem:[%s681_s4] ss:$0 sm:$0xff]  ;;  %s361_s22 = sshll.u32 %s549_s3, 4  ;;  %s362_s22 = int_to_ptr.vmem [resolvable:$true] %s361_s22 }
 0x121   :  { %442 = vpow2.f32 %v201_v30  ;;  %431 = vmatpush3.bf16.msra.mxu1 %v428_v16  ;;  %s516_s4 = scalar_lea.vmem %s362_s22, 256  ;;  %p521_p11 = scmp.lt.s32.totalorder %s362_s22, %s362_s22 }
 0x122   :  { %444 = vpow2.f32 %v199_v32  ;;  %p517_p10 = scmp.ne.s32.totalorder %s362_s22, %s516_s4  ;;  %p522_p12 = scmp.lt.s32.totalorder %s516_s4, %s516_s4 }
 0x124   :  { %p523_p13 = por %p522_p12, %p521_p11 }
 0x126   :  { %p524_p0 = pnand %p523_p13, %p517_p10 }
 0x129   :  { %v439_v23 = vpop.eup %438 }
 0x12a   :  { %v441_v25 = vpop.eup %440  ;;  %v178_v27 = vmul.f32 1.0614054, %v439_v23 }
 0x12b   :  { %v177_v28 = vmul.f32 1.0614054, %v441_v25  ;;  %v443_v46 = vpop.eup %442 }
 0x12c   :  { %v180_v29 = vadd.f32 -1.4531521, %v178_v27  ;;  %v445_v48 = vpop.eup %444 }
 0x12d   :  { %v179_v31 = vadd.f32 -1.4531521, %v177_v28 }
 0x12e   :  { %v182_v33 = vmul.f32 %v439_v23, %v180_v29 }
 0x12f   :  { %v181_v34 = vmul.f32 %v441_v25, %v179_v31 }
 0x130   :  { %v184_v35 = vadd.f32 1.4214138, %v182_v33  ;;  %v379_v33 = vld [vmem:[%s683_s6] ss:$0 sm:$0xff] }
 0x131   :  { %v183_v36 = vadd.f32 1.4214138, %v181_v34 }
 0x132   :  { %v186_v37 = vmul.f32 %v439_v23, %v184_v35 }
 0x133   :  { %v185_v38 = vmul.f32 %v441_v25, %v183_v36 }
 0x134   :  { %v188_v39 = vadd.f32 -0.28449672, %v186_v37 }
 0x135   :  { %v187_v40 = vadd.f32 -0.28449672, %v185_v38 }
 0x136   :  { %v190_v41 = vmul.f32 %v439_v23, %v188_v39 }
 0x137   :  { %v189_v42 = vmul.f32 %v441_v25, %v187_v40 }
 0x138   :  { %v192_v43 = vadd.f32 0.2548296, %v190_v41 }
 0x139   :  { %v191_v44 = vadd.f32 0.2548296, %v189_v42 }
 0x13a   :  { %v194_v45 = vmul.f32 %v439_v23, %v192_v43 }
 0x13b   :  { %v193_v47 = vmul.f32 %v441_v25, %v191_v44 }
 0x13c   :  { %v204_v49 = vmul.f32 %v443_v46, %v194_v45 }
 0x13d   :  { %v203_v50 = vmul.f32 %v445_v48, %v193_v47 }
 0x13e   :  { %v206_v51 = vsub.f32 1.0, %v204_v49 }
 0x13f   :  { %v205_v52 = vsub.f32 1.0, %v203_v50 }
 0x140   :  { %v210_v53 = vsub.f32 0.0, %v206_v51 }
 0x141   :  { %v209_v54 = vsub.f32 0.0, %v205_v52 }
 0x142   :  { %v212_v55 = vsel %vm208_vm1, %v210_v53, %v206_v51 }
 0x143   :  { %v211_v56 = vsel %vm207_vm2, %v209_v54, %v205_v52  ;;  %v214_v59 = vadd.f32 1.0, %v212_v55 }
 0x144   :  { %v213_v58 = vadd.f32 1.0, %v211_v56 }
 0x145   :  { %v216_v63 = vmul.f32 %v214_v59, %v164_v60 }
 0x146   :  { %v215_v61 = vmul.f32 %v213_v58, %v163_v57 }
 0x147   :  { %v220_v0 = vsel %vm81_vm0, %v216_v63, 0.0 }
 0x148   :  { %v217_v62 = vsel %vm81_vm0, %v215_v61, 0.0 }
 0x149   :  { %218 = vadd.xlane.f32.xlu0 %v217_v62 }
 0x14d   :  { %221 = vadd.xlane.f32.xlu0 %v220_v0 }
 0x1d6   :  { %v219_v1 = vpop.xlane.xlu0 %218 }
 0x1d7   :  { %v224_v2 = vmul.f32 0.03125, %v219_v1 }
 0x1d9   :  { %v226_v3 = vsub.f32 %v215_v61, %v224_v2 }
 0x1da   :  { %v222_v4 = vpop.xlane.xlu0 %221 }
 0x1db   :  { %v225_v5 = vmul.f32 0.03125, %v222_v4  ;;  %v228_v6 = vmul.f32 %v226_v3, %v226_v3 }
 0x1dd   :  { %v227_v7 = vsub.f32 %v216_v63, %v225_v5  ;;  %v230_v8 = vsel %vm81_vm0, %v228_v6, 0.0 }
 0x1de   :  { %231 = vadd.xlane.f32.xlu1 %v230_v8 }
 0x1df   :  { %v229_v9 = vmul.f32 %v227_v7, %v227_v7 }
 0x1e1   :  { %v233_v10 = vsel %vm81_vm0, %v229_v9, 0.0 }
 0x1e2   :  { %234 = vadd.xlane.f32.xlu1 %v233_v10 }
 0x26b   :  { %v232_v17 = vpop.xlane.xlu1 %231 }
 0x26c   :  { %v236_v18 = vmul.f32 0.03125, %v232_v17 }
 0x26e   :  { %v238_v19 = vadd.f32 1e-12, %v236_v18 }
 0x26f   :  { %v235_v20 = vpop.xlane.xlu1 %234 }
 0x270   :  { %446 = vrsqrt.f32 %v238_v19  ;;  %v237_v21 = vmul.f32 0.03125, %v235_v20 }
 0x272   :  { %v239_v22 = vadd.f32 1e-12, %v237_v21 }
 0x274   :  { %448 = vrsqrt.f32 %v239_v22 }
 0x27a   :  { %v447_v23 = vpop.eup %446 }
 0x27b   :  { %v242_v25 = vmul.f32 %v447_v23, %v226_v3 }
 0x27d   :  { %v251_v27 = vmul.f32 %v377_v24, %v242_v25 }
 0x27e   :  { %v449_v28 = vpop.eup %448 }
 0x27f   :  { %v243_v29 = vmul.f32 %v449_v28, %v227_v7  ;;  %v260_v30 = vadd.f32 %v378_v26, %v251_v27 }
 0x281   :  { %v252_v31 = vmul.f32 %v377_v24, %v243_v29  ;;  %413 = vmatprep.mubr.msk.f32.mxu1 %vm81_vm0, %v260_v30 }
 0x283   :  { %v261_v32 = vadd.f32 %v378_v26, %v252_v31 }
 0x285   :  { %414 = vmatmul.mubr.msk.f32.vlgmr.msra.gmra.mrb[0].mxu1 %vm81_vm0, %v261_v32 }
 0x358   :  { %v415_v34 = vpop.f32.mrb[0].mxu1 }
 0x359   :  { %v351_v35 = vadd.f32 %v415_v34, %v379_v33  ;;  %v345_v36 = vpop.f32.mrb[1].mxu1 }
 0x35a   :  { %v346_v37 = vadd.f32 %v379_v33, %v345_v36 }
 0x35b   :  { %355 = vst [vmem:[#allocation8 + $0x8] sm:$0xff] %v351_v35 }
 0x35c   :  { %354 = vst [vmem:[#allocation8] sm:$0xff] %v346_v37 }
 0x35d   :  { %527 = shalt.err (!%p524_p0)
}
 0x35e   :  { %s528_s6 = scalar_lea.hbm %s684_s7, 256 }
 0x35f   :  { %p529_p1 = scmp.ne.s32.totalorder %s684_s7, %s528_s6  ;;  %p532_p2 = scmp.lt.u32.totalorder %s528_s6, %s684_s7 }
 0x361   :  { %p534_p3 = pnand %p532_p2, %p529_p1 }
 0x363   :  { %537 = shalt.err (!%p534_p3)
}
 0x364   :  { %367 = dma.vmem_to_hbm [thread:$0]  %s362_s22, 256, %s684_s7, [#allocation4], %s546_s13, %s546_s13, %s547_s14  }
 0x365   :  { %542 = dma.done.wait [#allocation4], 256  }
 0x366   :  { %543 = vsyncadd [#allocation4], 4294967040 }
 0x367   :  { %371 = vsyncpa [#allocation3], 1 }
 0x368   :  { %372 = vsyncpa [#allocation6], 1 }
 0x369   :  { %373 = vsyncpa [#allocation4], 1 }

</bundles_post_ra>
